<compile_context>
chip_gen: v7x
topology: tpu7x:2x2x1
jax: 0.10.0
libtpu: 0.0.40
codegen_flags: <defaults>
</compile_context>

<pallas_src>
import functools

import jax
import jax.numpy as jnp
from jax.experimental import pallas as pl
from jax.experimental.pallas import tpu as pltpu


def _round_up(a: int, b: int) -> int:
    return (a + b - 1) // b * b


def _mlp_kernel(x_ref, wg_ref, wu_ref, wd_ref, o_ref, acc_ref):
    """One (token-tile, I-chunk) step of the gated MLP.

    x_ref  : (tm, H)   token activations (resident across k)
    wg_ref : (H, ti)   gate_proj weight chunk
    wu_ref : (H, ti)   up_proj weight chunk
    wd_ref : (ti, H)   down_proj weight chunk
    o_ref  : (tm, H)   output tile (written on last k)
    acc_ref: (tm, H)   f32 accumulator scratch
    """
    k = pl.program_id(1)

    x = x_ref[...]
    # gate = x @ Wg_chunk, up = x @ Wu_chunk   (MXU, f32 accumulate)
    gate = jnp.dot(x, wg_ref[...], preferred_element_type=jnp.float32)
    up = jnp.dot(x, wu_ref[...], preferred_element_type=jnp.float32)
    # SiLU(gate) * up on the (tm, ti) chunk only (stays in vregs; sigmoid -> EUP)
    h = (gate * jax.nn.sigmoid(gate)) * up
    # Partial down-projection for this I-chunk (bf16 into MXU, f32 out).
    partial = jnp.dot(h.astype(x.dtype), wd_ref[...],
                      preferred_element_type=jnp.float32)

    # First chunk writes the accumulator directly (saves a zero-init pass);
    # later chunks accumulate in f32.
    @pl.when(k == 0)
    def _():
        acc_ref[...] = partial

    @pl.when(k != 0)
    def _():
        acc_ref[...] = acc_ref[...] + partial

    @pl.when(k == pl.num_programs(1) - 1)
    def _():
        o_ref[...] = acc_ref[...].astype(o_ref.dtype)


@functools.partial(jax.jit, static_argnames=("tm", "ti"))
def deepseek_v3_mlp(x, wg, wu, wd, *, tm: int = 256, ti: int = 512):
    """x: [B, S, H]; wg/wu: [H, I]; wd: [I, H] -> [B, S, H]."""
    B, S, H = x.shape
    Hw, I = wg.shape
    assert Hw == H and wu.shape == (H, I) and wd.shape == (I, H)

    M = B * S
    x2d = x.reshape(M, H)

    w_bytes = jnp.dtype(wg.dtype).itemsize
    x_bytes = jnp.dtype(x.dtype).itemsize

    # Token tile: big enough to fill MXU rows for prefill; shrink to the
    # (8-aligned) token count for small-M / decode so weights stream once.
    tm = min(tm, _round_up(M, 8))
    M_pad = _round_up(M, tm)

    # Intermediate chunk: multiple of 128 lanes.  Auto-shrink so the
    # double-buffered 3-weight working set (2 * 3 * H * ti * w_bytes) stays
    # under ~36 MiB, which keeps the whole kernel inside v7x's 64 MiB VMEM
    # at DeepseekV3 hidden sizes.
    weight_budget = 36 << 20
    max_ti = max(128, (weight_budget // (6 * H * w_bytes)) // 128 * 128)
    ti = min(ti, max_ti, _round_up(I, 128))
    I_pad = _round_up(I, ti)

    # Zero padding is exact: padded gate/up columns give silu(0)*0 == 0 and
    # padded down_proj rows are zero; padded token rows are sliced off below.
    if M_pad != M:
        x2d = jnp.pad(x2d, ((0, M_pad - M), (0, 0)))
    if I_pad != I:
        wg = jnp.pad(wg, ((0, 0), (0, I_pad - I)))
        wu = jnp.pad(wu, ((0, 0), (0, I_pad - I)))
        wd = jnp.pad(wd, ((0, I_pad - I), (0, 0)))

    n_m = M_pad // tm
    n_i = I_pad // ti

    # Working set: double-buffered weight chunks + x tile + out tile + f32 acc.
    vmem_needed = (
        2 * (3 * H * ti * w_bytes)
        + 2 * tm * H * x_bytes
        + 2 * tm * H * x_bytes
        + tm * H * 4
    )
    vmem_limit = min(int(vmem_needed * 1.5) + (4 << 20), 128 << 20)

    cost = pl.CostEstimate(
        flops=6 * M_pad * H * I_pad,
        transcendentals=M_pad * I_pad,
        bytes_accessed=(3 * H * I_pad * w_bytes) * n_m
        + 2 * M_pad * H * x_bytes,
    )

    # TODO(synk): int8/fp8 weight path (quantized MXU) not implemented; bf16 only.
    out2d = pl.pallas_call(
        _mlp_kernel,
        out_shape=jax.ShapeDtypeStruct((M_pad, H), x.dtype),
        grid_spec=pltpu.PrefetchScalarGridSpec(
            num_scalar_prefetch=0,
            grid=(n_m, n_i),
            in_specs=[
                pl.BlockSpec((tm, H), lambda i, k: (i, 0)),   # x tile (resident over k)
                pl.BlockSpec((H, ti), lambda i, k: (0, k)),   # gate weight chunk
                pl.BlockSpec((H, ti), lambda i, k: (0, k)),   # up weight chunk
                pl.BlockSpec((ti, H), lambda i, k: (k, 0)),   # down weight chunk
            ],
            out_specs=pl.BlockSpec((tm, H), lambda i, k: (i, 0)),
            scratch_shapes=[pltpu.VMEM((tm, H), jnp.float32)],
        ),
        compiler_params=pltpu.CompilerParams(
            dimension_semantics=("parallel", "arbitrary"),
            vmem_limit_bytes=vmem_limit,
        ),
        cost_estimate=cost,
    )(x2d, wg, wu, wd)

    return out2d[:M].reshape(B, S, H)


def _reference_mlp(x, wg, wu, wd):
    gate = jnp.einsum("bsh,hi->bsi", x, wg)
    up = jnp.einsum("bsh,hi->bsi", x, wu)
    h = jax.nn.silu(gate) * up
    return jnp.einsum("bsi,ih->bsh", h, wd)


def _make_inputs(key, B, S, H, I, dtype):
    kx, kg, ku, kd = jax.random.split(key, 4)
    x = jax.random.normal(kx, (B, S, H), jnp.float32).astype(dtype)
    # Deterministic nn.Linear-like init, stored as [in, out].
    wg = (jax.random.normal(kg, (H, I), jnp.float32) * (1.0 / H) ** 0.5).astype(dtype)
    wu = (jax.random.normal(ku, (H, I), jnp.float32) * (1.0 / H) ** 0.5).astype(dtype)
    wd = (jax.random.normal(kd, (I, H), jnp.float32) * (1.0 / I) ** 0.5).astype(dtype)
    return x, wg, wu, wd


if __name__ == "__main__":
    key = jax.random.PRNGKey(0)
    dtype = jnp.bfloat16  # production-representative operand dtype

    # Main case: small shapes consistent with the module (hidden, intermediate).
    B, S, H, I = 2, 8, 128, 256
    x, wg, wu, wd = _make_inputs(key, B, S, H, I, dtype)
    out = jax.block_until_ready(deepseek_v3_mlp(x, wg, wu, wd))
    ref = _reference_mlp(x.astype(jnp.float32), wg.astype(jnp.float32),
                         wu.astype(jnp.float32), wd.astype(jnp.float32))
    assert out.shape == (B, S, H)
    assert jnp.allclose(out.astype(jnp.float32), ref, atol=1e-1, rtol=1e-1), \
        "mismatch vs reference (aligned case)"

    # Ragged case exercising M / I zero-padding paths.
    B2, S2, H2, I2 = 2, 5, 128, 320
    x2, wg2, wu2, wd2 = _make_inputs(jax.random.PRNGKey(1), B2, S2, H2, I2, dtype)
    out2 = jax.block_until_ready(deepseek_v3_mlp(x2, wg2, wu2, wd2))
    ref2 = _reference_mlp(x2.astype(jnp.float32), wg2.astype(jnp.float32),
                          wu2.astype(jnp.float32), wd2.astype(jnp.float32))
    assert out2.shape == (B2, S2, H2)
    assert jnp.allclose(out2.astype(jnp.float32), ref2, atol=1e-1, rtol=1e-1), \
        "mismatch vs reference (ragged case)"

    print("KERNEL_OK")
</pallas_src>

<mosaic_0001>
module attributes {stable_mosaic.version = 11 : i64} {
  func.func @_mlp_kernel(%arg0: i32, %arg1: i32, %arg2: memref<16x128xbf16, #tpu.memory_space<vmem>>, %arg3: memref<128x256xbf16, #tpu.memory_space<vmem>>, %arg4: memref<128x256xbf16, #tpu.memory_space<vmem>>, %arg5: memref<256x128xbf16, #tpu.memory_space<vmem>>, %arg6: memref<16x128xbf16, #tpu.memory_space<vmem>>, %arg7: memref<16x128xf32, #tpu.memory_space<vmem>>) attributes {dimension_semantics = [#tpu.dimension_semantics<parallel>, #tpu.dimension_semantics<arbitrary>], iteration_bounds = array<i64: 1, 1>, scalar_prefetch = 0 : i64, scratch_operands = 1 : i64, tpu.core_type = #tpu.core_type<tc>, window_params = [{transform_indices = @transform_0, window_bounds = array<i64: 16, 128>}, {transform_indices = @transform_1, window_bounds = array<i64: 128, 256>}, {transform_indices = @transform_2, window_bounds = array<i64: 128, 256>}, {transform_indices = @transform_3, window_bounds = array<i64: 256, 128>}, {transform_indices = @transform_4, window_bounds = array<i64: 16, 128>}]} {
    %c0 = arith.constant 0 : index
    %c0_0 = arith.constant 0 : index
    %0 = vector.load %arg2[%c0, %c0_0] : memref<16x128xbf16, #tpu.memory_space<vmem>>, vector<16x128xbf16>
    %c0_1 = arith.constant 0 : index
    %c0_2 = arith.constant 0 : index
    %1 = vector.load %arg3[%c0_1, %c0_2] : memref<128x256xbf16, #tpu.memory_space<vmem>>, vector<128x256xbf16>
    %cst = arith.constant dense<0.000000e+00> : vector<16x256xf32>
    %2 = tpu.matmul %0, %1, %cst {dimension_numbers = #tpu.dot_dimension_numbers<[1], [0], [0], [1], [0, 0, 1, 1], [], []>} : vector<16x128xbf16>, vector<128x256xbf16>, vector<16x256xf32> -> vector<16x256xf32>
    %c0_3 = arith.constant 0 : index
    %c0_4 = arith.constant 0 : index
    %3 = vector.load %arg4[%c0_3, %c0_4] : memref<128x256xbf16, #tpu.memory_space<vmem>>, vector<128x256xbf16>
    %cst_5 = arith.constant dense<0.000000e+00> : vector<16x256xf32>
    %4 = tpu.matmul %0, %3, %cst_5 {dimension_numbers = #tpu.dot_dimension_numbers<[1], [0], [0], [1], [0, 0, 1, 1], [], []>} : vector<16x128xbf16>, vector<128x256xbf16>, vector<16x256xf32> -> vector<16x256xf32>
    %5 = arith.negf %2 : vector<16x256xf32>
    %6 = math.exp %5 : vector<16x256xf32>
    %cst_6 = arith.constant 1.000000e+00 : f32
    %7 = vector.broadcast %cst_6 : f32 to vector<16x256xf32>
    %8 = arith.addf %7, %6 : vector<16x256xf32>
    %9 = arith.divf %7, %8 : vector<16x256xf32>
    %10 = arith.mulf %2, %9 : vector<16x256xf32>
    %11 = arith.mulf %10, %4 : vector<16x256xf32>
    %12 = arith.truncf %11 : vector<16x256xf32> to vector<16x256xbf16>
    %c0_7 = arith.constant 0 : index
    %c0_8 = arith.constant 0 : index
    %13 = vector.load %arg5[%c0_7, %c0_8] : memref<256x128xbf16, #tpu.memory_space<vmem>>, vector<256x128xbf16>
    %cst_9 = arith.constant dense<0.000000e+00> : vector<16x128xf32>
    %14 = tpu.matmul %12, %13, %cst_9 {dimension_numbers = #tpu.dot_dimension_numbers<[1], [0], [0], [1], [0, 0, 1, 1], [], []>} : vector<16x256xbf16>, vector<256x128xbf16>, vector<16x128xf32> -> vector<16x128xf32>
    %c0_i32 = arith.constant 0 : i32
    %15 = arith.cmpi eq, %arg1, %c0_i32 : i32
    %16 = arith.extui %15 : i1 to i32
    %c0_i32_10 = arith.constant 0 : i32
    %17 = arith.cmpi ne, %16, %c0_i32_10 : i32
    scf.if %17 {
      %c0_15 = arith.constant 0 : index
      %c0_16 = arith.constant 0 : index
      %24 = vector.load %arg7[%c0_15, %c0_16] : memref<16x128xf32, #tpu.memory_space<vmem>>, vector<16x128xf32>
      tpu.vector_store %arg7[%c0_15, %c0_16], %14 {strides = array<i32>} : memref<16x128xf32, #tpu.memory_space<vmem>>, vector<16x128xf32>,
    } else {
    }
    %c0_i32_11 = arith.constant 0 : i32
    %18 = arith.cmpi ne, %arg1, %c0_i32_11 : i32
    %19 = arith.extui %18 : i1 to i32
    %c0_i32_12 = arith.constant 0 : i32
    %20 = arith.cmpi ne, %19, %c0_i32_12 : i32
    scf.if %20 {
      %c0_15 = arith.constant 0 : index
      %c0_16 = arith.constant 0 : index
      %24 = vector.load %arg7[%c0_15, %c0_16] : memref<16x128xf32, #tpu.memory_space<vmem>>, vector<16x128xf32>
      %25 = arith.addf %24, %14 : vector<16x128xf32>
      %c0_17 = arith.constant 0 : index
      %c0_18 = arith.constant 0 : index
      %26 = vector.load %arg7[%c0_17, %c0_18] : memref<16x128xf32, #tpu.memory_space<vmem>>, vector<16x128xf32>
      tpu.vector_store %arg7[%c0_17, %c0_18], %25 {strides = array<i32>} : memref<16x128xf32, #tpu.memory_space<vmem>>, vector<16x128xf32>,
    } else {
    }
    %c0_i32_13 = arith.constant 0 : i32
    %21 = arith.cmpi eq, %arg1, %c0_i32_13 : i32
    %22 = arith.extui %21 : i1 to i32
    %c0_i32_14 = arith.constant 0 : i32
    %23 = arith.cmpi ne, %22, %c0_i32_14 : i32
    scf.if %23 {
      %c0_15 = arith.constant 0 : index
      %c0_16 = arith.constant 0 : index
      %24 = vector.load %arg7[%c0_15, %c0_16] : memref<16x128xf32, #tpu.memory_space<vmem>>, vector<16x128xf32>
      %25 = arith.truncf %24 : vector<16x128xf32> to vector<16x128xbf16>
      %c0_17 = arith.constant 0 : index
      %c0_18 = arith.constant 0 : index
      %26 = vector.load %arg6[%c0_17, %c0_18] : memref<16x128xbf16, #tpu.memory_space<vmem>>, vector<16x128xbf16>
      tpu.vector_store %arg6[%c0_17, %c0_18], %25 {strides = array<i32>} : memref<16x128xbf16, #tpu.memory_space<vmem>>, vector<16x128xbf16>,
    } else {
    }
    return
  }
  func.func @transform_0(%arg0: i32, %arg1: i32) -> (i32, i32) {
    %c0_i32 = arith.constant 0 : i32
    %c0_i32_0 = arith.constant 0 : i32
    return %arg0, %c0_i32 : i32, i32
  }
  func.func @transform_1(%arg0: i32, %arg1: i32) -> (i32, i32) {
    %c0_i32 = arith.constant 0 : i32
    %c0_i32_0 = arith.constant 0 : i32
    return %c0_i32, %arg1 : i32, i32
  }
  func.func @transform_2(%arg0: i32, %arg1: i32) -> (i32, i32) {
    %c0_i32 = arith.constant 0 : i32
    %c0_i32_0 = arith.constant 0 : i32
    return %c0_i32, %arg1 : i32, i32
  }
  func.func @transform_3(%arg0: i32, %arg1: i32) -> (i32, i32) {
    %c0_i32 = arith.constant 0 : i32
    %c0_i32_0 = arith.constant 0 : i32
    return %arg1, %c0_i32 : i32, i32
  }
  func.func @transform_4(%arg0: i32, %arg1: i32) -> (i32, i32) {
    %c0_i32 = arith.constant 0 : i32
    %c0_i32_0 = arith.constant 0 : i32
    return %arg0, %c0_i32 : i32, i32
  }
}

</mosaic_0001>

<bundles_post_ra>
// kernel: deepseek_v3_mlp.1
= control target key start
LH: loop header
LB: loop body
LE: loop exit
PB: predicated region body
PF: predicated region fallthrough
CT: control target
= control target key end

     0   :  { %9 = vsyncpa [#allocation4], 0  ;;  %s1023_s0 = inlined_call_operand.hbm [shape: bf16[16,128], index: 0, kind: input, shape index: {}]   ;;  %s1024_s1 = inlined_call_operand.hbm [shape: bf16[128,256], index: 1, kind: input, shape index: {}]   ;;  %s1025_s2 = inlined_call_operand.hbm [shape: bf16[128,256], index: 2, kind: input, shape index: {}]   ;;  %s1026_s3 = inlined_call_operand.hbm [shape: bf16[256,128], index: 3, kind: input, shape index: {}]   ;;  %s1027_s4 = inlined_call_operand.hbm [shape: bf16[16,128], index: 4, kind: output, shape index: {}]  }
   0x1   :  { %10 = vsyncpa [#allocation7], 0 }
   0x2   :  { %11 = vsyncpa [#allocation10], 0 }
   0x3   :  { %12 = vsyncpa [#allocation5], 0  ;;  %s906_s15 = smov [#allocation6]   ;;  %s788_s19 = scalar_lea.hbm %s1024_s1, 2048 }
   0x4   :  { %s30_s16 = sshll.u32 %s906_s15, 4  ;;  %p789_p0 = scmp.ne.s32.totalorder %s1024_s1, %s788_s19  ;;  %s31_s16 = int_to_ptr.vmem [resolvable:$true] %s30_s16 }
   0x5   :  { %p792_p1 = scmp.lt.u32.totalorder %s788_s19, %s1024_s1 }
   0x7   :  { %p794_p2 = pnand %p792_p1, %p789_p0 }
   0x9   :  { %797 = shalt.err (!%p794_p2)
}
   0xa   :  { %s798_s24 = scalar_lea.vmem %s31_s16, 2048  ;;  %p803_p4 = scmp.lt.s32.totalorder %s31_s16, %s31_s16 }
   0xb   :  { %p799_p3 = scmp.ne.s32.totalorder %s31_s16, %s798_s24  ;;  %p804_p5 = scmp.lt.s32.totalorder %s798_s24, %s798_s24 }
   0xd   :  { %p805_p6 = por %p804_p5, %p803_p4 }
   0xf   :  { %p806_p7 = pnand %p805_p6, %p799_p3 }
  0x11   :  { %809 = shalt.err (!%p806_p7)
}
  0x12   :  { %s907_s25 = smov 128   ;;  %s908_s26 = smov 8  }
  0x13   :  { %36 = dma.hbm_to_vmem [thread:$0]  %s1024_s1, 2048, %s31_s16, [#allocation7], %s907_s25, %s907_s25, %s908_s26  }
  0x14   :  { %s909_s29 = smov [#allocation3]   ;;  %s810_s7 = scalar_lea.hbm %s1023_s0, 128 }
  0x15   :  { %s18_s30 = sshll.u32 %s909_s29, 4  ;;  %p811_p8 = scmp.ne.s32.totalorder %s1023_s0, %s810_s7  ;;  %s19_s30 = int_to_ptr.vmem [resolvable:$true] %s18_s30 }
  0x16   :  { %p814_p9 = scmp.lt.u32.totalorder %s810_s7, %s1023_s0 }
  0x18   :  { %p816_p10 = pnand %p814_p9, %p811_p8 }
  0x1a   :  { %819 = shalt.err (!%p816_p10)
}
  0x1b   :  { %s820_s12 = scalar_lea.vmem %s19_s30, 128  ;;  %p825_p12 = scmp.lt.s32.totalorder %s19_s30, %s19_s30 }
  0x1c   :  { %p821_p11 = scmp.ne.s32.totalorder %s19_s30, %s820_s12  ;;  %p826_p13 = scmp.lt.s32.totalorder %s820_s12, %s820_s12 }
  0x1e   :  { %p827_p0 = por %p826_p13, %p825_p12 }
  0x20   :  { %p828_p1 = pnand %p827_p0, %p821_p11 }
  0x22   :  { %831 = shalt.err (!%p828_p1)
}
  0x23   :  { %s910_s1 = smov 64   ;;  %s911_s13 = smov 4  }
  0x24   :  { %24 = dma.hbm_to_vmem [thread:$0]  %s1023_s0, 128, %s19_s30, [#allocation4], %s910_s1, %s910_s1, %s911_s13  }
  0x25   :  { %s912_s16 = smov [#allocation8]   ;;  %s913_s18 = smov [#allocation9]  }
  0x26   :  { %s42_s17 = sshll.u32 %s912_s16, 4  ;;  %s54_s19 = sshll.u32 %s913_s18, 4  ;;  %s43_s17 = int_to_ptr.vmem [resolvable:$true] %s42_s17  ;;  %s971_s19 = int_to_ptr.vmem [resolvable:$true] %s54_s19 }
  0x27   :  { %s832_s22 = scalar_lea.hbm %s1025_s2, 2048 }
  0x28   :  { %p833_p2 = scmp.ne.s32.totalorder %s1025_s2, %s832_s22  ;;  %p836_p3 = scmp.lt.u32.totalorder %s832_s22, %s1025_s2 }
  0x2a   :  { %p838_p4 = pnand %p836_p3, %p833_p2 }
  0x2c   :  { %841 = shalt.err (!%p838_p4)
}
  0x2d   :  { %s842_s0 = scalar_lea.vmem %s43_s17, 2048  ;;  %p847_p6 = scmp.lt.s32.totalorder %s43_s17, %s43_s17 }
  0x2e   :  { %p843_p5 = scmp.ne.s32.totalorder %s43_s17, %s842_s0  ;;  %p848_p7 = scmp.lt.s32.totalorder %s842_s0, %s842_s0 }
  0x30   :  { %p849_p8 = por %p848_p7, %p847_p6 }
  0x32   :  { %p850_p9 = pnand %p849_p8, %p843_p5 }
  0x34   :  { %853 = shalt.err (!%p850_p9)
}
  0x35   :  { %48 = dma.hbm_to_vmem [thread:$0]  %s1025_s2, 2048, %s43_s17, [#allocation7], %s907_s25, %s907_s25, %s908_s26  }
  0x36   :  { %s854_s7 = scalar_lea.hbm %s1026_s3, 2048 }
  0x37   :  { %p855_p10 = scmp.ne.s32.totalorder %s1026_s3, %s854_s7  ;;  %p858_p11 = scmp.lt.u32.totalorder %s854_s7, %s1026_s3 }
  0x39   :  { %p860_p12 = pnand %p858_p11, %p855_p10 }
  0x3b   :  { %863 = shalt.err (!%p860_p12)
}
  0x3c   :  { %s864_s12 = scalar_lea.vmem %s971_s19, 2048  ;;  %p869_p0 = scmp.lt.s32.totalorder %s971_s19, %s971_s19 }
  0x3d   :  { %p865_p13 = scmp.ne.s32.totalorder %s971_s19, %s864_s12  ;;  %p870_p1 = scmp.lt.s32.totalorder %s864_s12, %s864_s12 }
  0x3f   :  { %p871_p2 = por %p870_p1, %p869_p0 }
  0x41   :  { %p872_p3 = pnand %p871_p2, %p865_p13 }
  0x43   :  { %875 = shalt.err (!%p872_p3)
}
  0x44   :  { %60 = dma.hbm_to_vmem [thread:$0]  %s1026_s3, 2048, %s971_s19, [#allocation10], %s910_s1, %s910_s1, %s911_s13  }
  0x45   :  { %898 = dma.done.wait [#allocation4], 128  }
  0x46   :  { %899 = vsyncadd [#allocation4], 4294967168 }
  0x47   :  { %900 = dma.done.wait [#allocation7], 4096  }
  0x48   :  { %901 = vsyncadd [#allocation7], 4294963200 }
  0x49   :  { %902 = dma.done.wait [#allocation10], 2048  }
  0x4a   :  { %903 = vsyncadd [#allocation10], 4294965248  ;;  %v914_v0 = vmov 0   ;;  %v707_v1 = vld [vmem:[#allocation6 + $0x4] ss:$8 sps:$4 sm:$0xff]   ;;  %v737_v29 = vld [vmem:[#allocation3] sm:$0xff]  }
  0x4b   :  { %210 = vmatprep.mubr.bf16.mxu0 %v914_v0  ;;  %349 = vmatprep.mubr.bf16.mxu1 %v914_v0  ;;  %v709_v2 = vld [vmem:[#allocation6] ss:$8 sps:$4 sm:$0xff]   ;;  %v710_v3 = vld [vmem:[#allocation6 + $0x14] ss:$8 sps:$4 sm:$0xff]   ;;  %v712_v4 = vld [vmem:[#allocation6 + $0x10] ss:$8 sps:$4 sm:$0xff]  }
  0x4c   :  { %178 = vmatprep.subr.bf16.mxu0 %v707_v1  ;;  %v713_v5 = vld [vmem:[#allocation6 + $0x24] ss:$8 sps:$4 sm:$0xff]   ;;  %v715_v6 = vld [vmem:[#allocation6 + $0x20] ss:$8 sps:$4 sm:$0xff]   ;;  %v716_v7 = vld [vmem:[#allocation6 + $0x34] ss:$8 sps:$4 sm:$0xff]  }
  0x4d   :  { %179 = vmatpush1.bf16.msra.mxu0 %v709_v2  ;;  %v728_v8 = vld [vmem:[#allocation8 + $0x4] ss:$8 sps:$4 sm:$0xff]   ;;  %v730_v9 = vld [vmem:[#allocation8] ss:$8 sps:$4 sm:$0xff]   ;;  %v718_v10 = vld [vmem:[#allocation6 + $0x30] ss:$8 sps:$4 sm:$0xff]  }
  0x4e   :  { %180 = vmatprep.subr.bf16.mxu0 %v710_v3  ;;  %v719_v11 = vld [vmem:[#allocation6 + $0x44] ss:$8 sps:$4 sm:$0xff]   ;;  %317 = vmatprep.subr.bf16.mxu1 %v728_v8  ;;  %v734_v12 = vld [vmem:[#allocation8 + $0x14] ss:$8 sps:$4 sm:$0xff]   ;;  %v736_v13 = vld [vmem:[#allocation8 + $0x10] ss:$8 sps:$4 sm:$0xff]  }
  0x4f   :  { %318 = vmatpush1.bf16.msra.mxu1 %v730_v9  ;;  %v721_v14 = vld [vmem:[#allocation6 + $0x40] ss:$8 sps:$4 sm:$0xff]   ;;  %v738_v15 = vld [vmem:[#allocation8 + $0x24] ss:$8 sps:$4 sm:$0xff]   ;;  %v722_v16 = vld [vmem:[#allocation6 + $0x54] ss:$8 sps:$4 sm:$0xff]  }
  0x50   :  { %319 = vmatprep.subr.bf16.mxu1 %v734_v12  ;;  %v740_v17 = vld [vmem:[#allocation8 + $0x20] ss:$8 sps:$4 sm:$0xff]   ;;  %v741_v18 = vld [vmem:[#allocation8 + $0x34] ss:$8 sps:$4 sm:$0xff]   ;;  %v724_v19 = vld [vmem:[#allocation6 + $0x50] ss:$8 sps:$4 sm:$0xff]  }
  0x51   :  { %181 = vmatpush1.bf16.msra.mxu0 %v712_v4  ;;  %v725_v20 = vld [vmem:[#allocation6 + $0x64] ss:$8 sps:$4 sm:$0xff]   ;;  %v727_v21 = vld [vmem:[#allocation6 + $0x60] ss:$8 sps:$4 sm:$0xff]   ;;  %v743_v22 = vld [vmem:[#allocation8 + $0x30] ss:$8 sps:$4 sm:$0xff]  }
  0x52   :  { %182 = vmatprep.subr.bf16.mxu0 %v713_v5  ;;  %v731_v23 = vld [vmem:[#allocation6 + $0x74] ss:$8 sps:$4 sm:$0xff]   ;;  %v744_v24 = vld [vmem:[#allocation8 + $0x44] ss:$8 sps:$4 sm:$0xff]   ;;  %v746_v25 = vld [vmem:[#allocation8 + $0x40] ss:$8 sps:$4 sm:$0xff]  }
  0x53   :  { %320 = vmatpush1.bf16.msra.mxu1 %v736_v13  ;;  %v747_v26 = vld [vmem:[#allocation8 + $0x54] ss:$8 sps:$4 sm:$0xff]   ;;  %v733_v27 = vld [vmem:[#allocation6 + $0x70] ss:$8 sps:$4 sm:$0xff]   ;;  %v750_v30 = vld [vmem:[#allocation8 + $0x64] ss:$8 sps:$4 sm:$0xff]  }
  0x54   :  { %321 = vmatprep.subr.bf16.mxu1 %v738_v15  ;;  %v749_v28 = vld [vmem:[#allocation8 + $0x50] ss:$8 sps:$4 sm:$0xff]   ;;  %v752_v31 = vld [vmem:[#allocation8 + $0x60] ss:$8 sps:$4 sm:$0xff]   ;;  %v753_v32 = vld [vmem:[#allocation8 + $0x74] ss:$8 sps:$4 sm:$0xff]  }
  0x55   :  { %183 = vmatpush1.bf16.msra.mxu0 %v715_v6  ;;  %v755_v33 = vld [vmem:[#allocation8 + $0x70] ss:$8 sps:$4 sm:$0xff]   ;;  %v756_v34 = vld [vmem:[#allocation9 + $0x40] sm:$0xff]   ;;  %v758_v36 = vld [vmem:[#allocation9 + $0x48] sm:$0xff]   ;;  %s915_s3 = smov [#allocation11]  }
  0x56   :  { %184 = vmatprep.subr.bf16.mxu0 %v716_v7  ;;  %v757_v35 = vld [vmem:[#allocation9] sm:$0xff]   ;;  %v759_v37 = vld [vmem:[#allocation9 + $0x8] sm:$0xff]   ;;  %v760_v38 = vld [vmem:[#allocation9 + $0x50] sm:$0xff]   ;;  %s599_s26 = sshll.u32 %s915_s3, 4  ;;  %s600_s26 = int_to_ptr.vmem [resolvable:$true] %s599_s26 }
  0x57   :  { %322 = vmatpush1.bf16.msra.mxu1 %v740_v17  ;;  %v761_v39 = vld [vmem:[#allocation9 + $0x10] sm:$0xff]   ;;  %v762_v40 = vld [vmem:[#allocation9 + $0x58] sm:$0xff]   ;;  %v764_v42 = vld [vmem:[#allocation9 + $0x60] sm:$0xff]   ;;  %s876_s14 = scalar_lea.vmem %s600_s26, 128  ;;  %p881_p5 = scmp.lt.s32.totalorder %s600_s26, %s600_s26 }
  0x58   :  { %323 = vmatprep.subr.bf16.mxu1 %v741_v18  ;;  %v763_v41 = vld [vmem:[#allocation9 + $0x18] sm:$0xff]   ;;  %v765_v43 = vld [vmem:[#allocation9 + $0x20] sm:$0xff]   ;;  %v766_v44 = vld [vmem:[#allocation9 + $0x68] sm:$0xff]   ;;  %p877_p4 = scmp.ne.s32.totalorder %s600_s26, %s876_s14  ;;  %p882_p6 = scmp.lt.s32.totalorder %s876_s14, %s876_s14 }
  0x59   :  { %185 = vmatpush1.bf16.msra.mxu0 %v718_v10  ;;  %v767_v45 = vld [vmem:[#allocation9 + $0x28] sm:$0xff]   ;;  %v768_v46 = vld [vmem:[#allocation9 + $0x70] sm:$0xff]   ;;  %v770_v48 = vld [vmem:[#allocation9 + $0x78] sm:$0xff]  }
  0x5a   :  { %186 = vmatprep.subr.bf16.mxu0 %v719_v11  ;;  %v769_v47 = vld [vmem:[#allocation9 + $0x30] sm:$0xff]   ;;  %v771_v49 = vld [vmem:[#allocation9 + $0x38] sm:$0xff]   ;;  %p883_p7 = por %p882_p6, %p881_p5 }
  0x5b   :  { %324 = vmatpush1.bf16.msra.mxu1 %v743_v22 }
  0x5c   :  { %325 = vmatprep.subr.bf16.mxu1 %v744_v24  ;;  %p884_p8 = pnand %p883_p7, %p877_p4 }
  0x5d   :  { %187 = vmatpush1.bf16.msra.mxu0 %v721_v14 }
  0x5e   :  { %188 = vmatprep.subr.bf16.mxu0 %v722_v16 }
  0x5f   :  { %326 = vmatpush1.bf16.msra.mxu1 %v746_v25 }
  0x60   :  { %327 = vmatprep.subr.bf16.mxu1 %v747_v26 }
  0x61   :  { %189 = vmatpush1.bf16.msra.mxu0 %v724_v19 }
  0x62   :  { %190 = vmatprep.subr.bf16.mxu0 %v725_v20 }
  0x63   :  { %328 = vmatpush1.bf16.msra.mxu1 %v749_v28 }
  0x64   :  { %329 = vmatprep.subr.bf16.mxu1 %v750_v30 }
  0x65   :  { %191 = vmatpush1.bf16.msra.mxu0 %v727_v21 }
  0x66   :  { %192 = vmatprep.subr.bf16.mxu0 %v731_v23 }
  0x67   :  { %330 = vmatpush1.bf16.msra.mxu1 %v752_v31 }
  0x68   :  { %331 = vmatprep.subr.bf16.mxu1 %v753_v32 }
  0x69   :  { %193 = vmatpush1.bf16.msra.mxu0 %v733_v27 }
  0x6a   :  { %675 = vmatprep.subr.bf16.mxu0 %v756_v34 }
  0x6b   :  { %332 = vmatpush1.bf16.msra.mxu1 %v755_v33 }
  0x6c   :  { %211 = vmatmul.mubr.bf16.vlgmr.msra.gmra.mrb[0].mxu0 %v737_v29 }
  0x6d   :  { %676 = vmatpush3.bf16.msra.mxu0 %v757_v35 }
  0x6e   :  { %350 = vmatmul.mubr.bf16.vlgmr.msra.gmra.mrb[0].mxu1 %v737_v29  ;;  %677 = vmatprep.subr.bf16.mxu0 %v758_v36 }
  0x71   :  { %678 = vmatpush3.bf16.msra.mxu0 %v759_v37 }
  0x72   :  { %679 = vmatprep.subr.bf16.mxu0 %v760_v38 }
  0x75   :  { %680 = vmatpush3.bf16.msra.mxu0 %v761_v39 }
  0x76   :  { %681 = vmatprep.subr.bf16.mxu0 %v762_v40 }
  0x79   :  { %682 = vmatpush3.bf16.msra.mxu0 %v763_v41 }
  0x7a   :  { %683 = vmatprep.subr.bf16.mxu0 %v764_v42 }
  0x7d   :  { %684 = vmatpush3.bf16.msra.mxu0 %v765_v43 }
  0x7e   :  { %685 = vmatprep.subr.bf16.mxu0 %v766_v44 }
  0x81   :  { %686 = vmatpush3.bf16.msra.mxu0 %v767_v45 }
  0x82   :  { %687 = vmatprep.subr.bf16.mxu0 %v768_v46 }
  0x85   :  { %688 = vmatpush3.bf16.msra.mxu0 %v769_v47 }
  0x86   :  { %689 = vmatprep.subr.bf16.mxu0 %v770_v48 }
  0x89   :  { %690 = vmatpush3.bf16.msra.mxu0 %v771_v49 }
 0x13f   :  { %v212_v50 = vpop.f32.mrb[0].mxu0 }
 0x140   :  { %v646_v51 = vmul.f32 -1.442695, %v212_v50  ;;  %v214_v52 = vpop.f32.mrb[1].mxu0 }
 0x141   :  { %v647_v53 = vmul.f32 -1.442695, %v214_v52  ;;  %v216_v54 = vpop.f32.mrb[2].mxu0  ;;  %v351_v58 = vpop.f32.mrb[0].mxu1 }
 0x142   :  { %772 = vpow2.f32 %v646_v51  ;;  %v648_v55 = vmul.f32 -1.442695, %v216_v54  ;;  %v218_v56 = vpop.f32.mrb[3].mxu0  ;;  %v353_v59 = vpop.f32.mrb[1].mxu1 }
 0x143   :  { %774 = vpow2.f32 %v647_v53  ;;  %v649_v57 = vmul.f32 -1.442695, %v218_v56  ;;  %v355_v60 = vpop.f32.mrb[2].mxu1 }
 0x144   :  { %776 = vpow2.f32 %v648_v55  ;;  %v357_v62 = vpop.f32.mrb[3].mxu1 }
 0x145   :  { %778 = vpow2.f32 %v649_v57 }
 0x14c   :  { %v773_v61 = vpop.eup %772 }
 0x14d   :  { %v775_v63 = vpop.eup %774  ;;  %v372_v0 = vadd.f32 1.0, %v773_v61 }
 0x14e   :  { %v777_v1 = vpop.eup %776  ;;  %v373_v2 = vadd.f32 1.0, %v775_v63 }
 0x14f   :  { %v779_v3 = vpop.eup %778  ;;  %780 = vrcp.f32 %v372_v0  ;;  %v374_v4 = vadd.f32 1.0, %v777_v1 }
 0x150   :  { %782 = vrcp.f32 %v373_v2  ;;  %v375_v5 = vadd.f32 1.0, %v779_v3 }
 0x151   :  { %784 = vrcp.f32 %v374_v4 }
 0x152   :  { %786 = vrcp.f32 %v375_v5 }
 0x159   :  { %v781_v6 = vpop.eup %780 }
 0x15a   :  { %v783_v7 = vpop.eup %782  ;;  %v384_v8 = vmul.f32 %v781_v6, %v212_v50 }
 0x15b   :  { %v785_v9 = vpop.eup %784  ;;  %v385_v10 = vmul.f32 %v783_v7, %v214_v52 }
 0x15c   :  { %v787_v11 = vpop.eup %786  ;;  %v386_v12 = vmul.f32 %v785_v9, %v216_v54  ;;  %v388_v13 = vmul.f32 %v384_v8, %v351_v58 }
 0x15d   :  { %v387_v14 = vmul.f32 %v787_v11, %v218_v56  ;;  %v389_v15 = vmul.f32 %v385_v10, %v353_v59 }
 0x15e   :  { %v390_v16 = vmul.f32 %v386_v12, %v355_v60 }
 0x15f   :  { %v391_v17 = vmul.f32 %v387_v14, %v357_v62 }
 0x160   :  { %v392_v18 = vpack.c.bf16 %v390_v16, %v388_v13 }
 0x161   :  { %v393_v19 = vpack.c.bf16 %v391_v17, %v389_v15 }
 0x163   :  { %554 = vmatprep.mubr.bf16.mxu0 %v393_v19 }
 0x164   :  { %555 = vmatmul.mubr.bf16.vlgmr.msra.gmra.mrb[4].mxu0 %v392_v18 }
 0x237   :  { %v691_v20 = vpop.f32.mrb[4].mxu0 }
 0x238   :  { %v692_v21 = vpop.f32.mrb[5].mxu0 }
 0x239   :  { %v693_v22 = vadd.f32 %v692_v21, %v691_v20  ;;  %v694_v23 = vpop.f32.mrb[6].mxu0 }
 0x23a   :  { %v695_v24 = vpop.f32.mrb[7].mxu0 }
 0x23b   :  { %v696_v25 = vadd.f32 %v695_v24, %v694_v23 }
 0x23d   :  { %v673_v26 = vpack.c.bf16 %v696_v25, %v693_v22 }
 0x23f   :  { %674 = vst [vmem:[#allocation11] sm:$0xff] %v673_v26  }
 0x240   :  { %887 = shalt.err (!%p884_p8)
}
 0x241   :  { %s888_s17 = scalar_lea.hbm %s1027_s4, 128 }
 0x242   :  { %p889_p9 = scmp.ne.s32.totalorder %s1027_s4, %s888_s17  ;;  %p892_p10 = scmp.lt.u32.totalorder %s888_s17, %s1027_s4 }
 0x244   :  { %p894_p11 = pnand %p892_p10, %p889_p9 }
 0x246   :  { %897 = shalt.err (!%p894_p11)
}
 0x247   :  { %605 = dma.vmem_to_hbm [thread:$0]  %s600_s26, 128, %s1027_s4, [#allocation5], %s910_s1, %s910_s1, %s911_s13  }
 0x248   :  { %904 = dma.done.wait [#allocation5], 128  }
 0x249   :  { %905 = vsyncadd [#allocation5], 4294967168 }
 0x24a   :  { %609 = vsyncpa [#allocation4], 1 }
 0x24b   :  { %610 = vsyncpa [#allocation7], 1 }
 0x24c   :  { %611 = vsyncpa [#allocation10], 1 }
 0x24d   :  { %612 = vsyncpa [#allocation5], 1 }

</bundles_post_ra>
